<compile_context>
chip_gen: v7x
topology: tpu7x:2x2x1
jax: 0.10.0
libtpu: 0.0.40
codegen_flags: <defaults>
</compile_context>

<pallas_src>
import jax
import jax.numpy as jnp
from jax import lax
from jax.experimental import pallas as pl
from jax.experimental.pallas import tpu as pltpu

_LANES = 128
_MAX_BLOCK_ROWS = 1024   # (1024, 128) f32 tile = 512 KiB per input


def _round_up(x, m):
    return (x + m - 1) // m * m


def _make_stats_kernel(block_rows, n_valid, needs_mask):
    """Kernel producing per-tile lane partials.

    out_ref block: (1, 8, 128) f32 with rows
      0: sum(a)  1: sum(a*a)  2: min(a)  3: max(a)
      4: sum(b)  5: sum(b*b)  6: min(b)  7: max(b)
    """

    def kernel(a_ref, b_ref, out_ref):
        a = a_ref[...].astype(jnp.float32)
        b = b_ref[...].astype(jnp.float32)

        if needs_mask:
            # Mask the zero-padded tail for min/max (sums are pad-neutral).
            t = pl.program_id(0)
            row_ids = lax.broadcasted_iota(jnp.int32, a.shape, 0)
            lane_ids = lax.broadcasted_iota(jnp.int32, a.shape, 1)
            idx = (t * block_rows + row_ids) * _LANES + lane_ids
            valid = idx < n_valid
            pinf = jnp.float32(jnp.inf)
            a_lo = jnp.where(valid, a, pinf)
            a_hi = jnp.where(valid, a, -pinf)
            b_lo = jnp.where(valid, b, pinf)
            b_hi = jnp.where(valid, b, -pinf)
        else:
            a_lo = a_hi = a
            b_lo = b_hi = b

        out_ref[0, 0:1, :] = jnp.sum(a, axis=0, keepdims=True)
        out_ref[0, 1:2, :] = jnp.sum(a * a, axis=0, keepdims=True)
        out_ref[0, 2:3, :] = jnp.min(a_lo, axis=0, keepdims=True)
        out_ref[0, 3:4, :] = jnp.max(a_hi, axis=0, keepdims=True)
        out_ref[0, 4:5, :] = jnp.sum(b, axis=0, keepdims=True)
        out_ref[0, 5:6, :] = jnp.sum(b * b, axis=0, keepdims=True)
        out_ref[0, 6:7, :] = jnp.min(b_lo, axis=0, keepdims=True)
        out_ref[0, 7:8, :] = jnp.max(b_hi, axis=0, keepdims=True)

    return kernel


def ssi_loss(img_ori, img_p):
    a = img_ori.reshape(-1)
    b = img_p.reshape(-1)
    n = a.size
    assert n == b.size, "img_ori and img_p must have the same element count"

    rows = pl.cdiv(n, _LANES)
    block_rows = min(_MAX_BLOCK_ROWS, _round_up(rows, 8))
    rows_padded = _round_up(rows, block_rows)
    total = rows_padded * _LANES
    needs_mask = total != n
    if needs_mask:
        a = jnp.pad(a, (0, total - n))
        b = jnp.pad(b, (0, total - n))
    a2 = a.reshape(rows_padded, _LANES)
    b2 = b.reshape(rows_padded, _LANES)
    num_tiles = rows_padded // block_rows

    kernel = _make_stats_kernel(block_rows, n, needs_mask)

    stats = pl.pallas_call(
        kernel,
        out_shape=jax.ShapeDtypeStruct((num_tiles, 8, _LANES), jnp.float32),
        grid=(num_tiles,),
        in_specs=[
            pl.BlockSpec((block_rows, _LANES), lambda t: (t, 0)),
            pl.BlockSpec((block_rows, _LANES), lambda t: (t, 0)),
        ],
        out_specs=pl.BlockSpec((1, 8, _LANES), lambda t: (t, 0, 0)),
        compiler_params=pltpu.CompilerParams(
            dimension_semantics=("parallel",)),
    )(a2, b2)

    # --- tiny scalar epilogue in plain JAX ------------------------------
    sum_a = jnp.sum(stats[:, 0, :])
    sumsq_a = jnp.sum(stats[:, 1, :])
    min_a = jnp.min(stats[:, 2, :])
    max_a = jnp.max(stats[:, 3, :])
    sum_b = jnp.sum(stats[:, 4, :])
    sumsq_b = jnp.sum(stats[:, 5, :])
    min_b = jnp.min(stats[:, 6, :])
    max_b = jnp.max(stats[:, 7, :])

    nf = jnp.float32(n)
    mean_a = sum_a / nf
    mean_b = sum_b / nf
    # unbiased (ddof=1) sample variance from raw moments
    var_a = (sumsq_a - nf * mean_a * mean_a) / (nf - 1.0)
    var_b = (sumsq_b - nf * mean_b * mean_b) / (nf - 1.0)
    std_a = jnp.sqrt(jnp.maximum(var_a, 0.0))
    std_b = jnp.sqrt(jnp.maximum(var_b, 0.0))

    eps = jnp.float32(1e-10)
    inv_ra = 1.0 / ((max_a - min_a) + eps)
    inv_rb = 1.0 / ((max_b - min_b) + eps)
    mean_an = (mean_a - min_a) * inv_ra   # mean of normalized img_ori
    std_an = std_a * inv_ra               # std  of normalized img_ori
    mean_bn = (mean_b - min_b) * inv_rb   # mean of normalized img_p
    std_bn = std_b * inv_rb               # std  of normalized img_p

    return std_an * mean_bn / (mean_an * std_bn)


def _ssi_loss_ref(img_ori, img_p):
    """Pure-JAX reference mirroring the PyTorch code literally."""
    def norm(x):
        rng = jnp.max(x) - jnp.min(x)
        return (x - jnp.min(x)) / (rng + 1e-10)
    a = norm(img_ori.astype(jnp.float32))
    b = norm(img_p.astype(jnp.float32))
    mean_a, mean_b = jnp.mean(a), jnp.mean(b)
    std_a = jnp.std(a, ddof=1)
    std_b = jnp.std(b, ddof=1)
    return std_a * mean_b / (mean_a * std_b)


if __name__ == "__main__":
    key = jax.random.PRNGKey(0)
    k1, k2, k3, k4 = jax.random.split(key, 4)

    # main test: NCHW = (2, 4, 16, 16)  (n = 2048, multiple of 128)
    img_ori = jax.random.uniform(k1, (2, 4, 16, 16), dtype=jnp.float32)
    img_p = jax.random.normal(k2, (2, 4, 16, 16), dtype=jnp.float32) * 0.5 + 0.3

    out = jax.block_until_ready(ssi_loss(img_ori, img_p))
    ref = jax.block_until_ready(_ssi_loss_ref(img_ori, img_p))
    assert jnp.isfinite(out), "kernel produced non-finite ssi"
    assert jnp.allclose(out, ref, rtol=1e-3, atol=1e-5), (out, ref)

    # secondary test: ragged element count (n = 2*3*15*17 = 1530) to exercise
    # the zero-pad + masked-min/max tail path.
    img_ori2 = jax.random.uniform(k3, (2, 3, 15, 17), dtype=jnp.float32)
    img_p2 = jax.random.normal(k4, (2, 3, 15, 17), dtype=jnp.float32) * 0.7 + 0.1
    out2 = jax.block_until_ready(ssi_loss(img_ori2, img_p2))
    ref2 = jax.block_until_ready(_ssi_loss_ref(img_ori2, img_p2))
    assert jnp.isfinite(out2), "kernel produced non-finite ssi (ragged case)"
    assert jnp.allclose(out2, ref2, rtol=1e-3, atol=1e-5), (out2, ref2)

    print("KERNEL_OK")
</pallas_src>

<mosaic_0001>
module attributes {stable_mosaic.version = 11 : i64} {
  func.func @kernel(%arg0: i32, %arg1: memref<16x128xf32, #tpu.memory_space<vmem>>, %arg2: memref<16x128xf32, #tpu.memory_space<vmem>>, %arg3: memref<1x8x128xf32, #tpu.memory_space<vmem>>) attributes {dimension_semantics = [#tpu.dimension_semantics<parallel>], iteration_bounds = array<i64: 1>, scalar_prefetch = 0 : i64, scratch_operands = 0 : i64, tpu.core_type = #tpu.core_type<tc>, window_params = [{transform_indices = @transform_0, window_bounds = array<i64: 16, 128>}, {transform_indices = @transform_1, window_bounds = array<i64: 16, 128>}, {transform_indices = @transform_2, window_bounds = array<i64: 1, 8, 128>}]} {
    %c0 = arith.constant 0 : index
    %c0_0 = arith.constant 0 : index
    %0 = vector.load %arg1[%c0, %c0_0] : memref<16x128xf32, #tpu.memory_space<vmem>>, vector<16x128xf32>
    %c0_1 = arith.constant 0 : index
    %c0_2 = arith.constant 0 : index
    %1 = vector.load %arg2[%c0_1, %c0_2] : memref<16x128xf32, #tpu.memory_space<vmem>>, vector<16x128xf32>
    %cst = arith.constant dense<0.000000e+00> : vector<128xf32>
    %2 = vector.multi_reduction <add>, %0, %cst [0] : vector<16x128xf32> to vector<128xf32>
    %3 = vector.shape_cast %2 : vector<128xf32> to vector<1x128xf32>
    %c0_3 = arith.constant 0 : index
    %c0_4 = arith.constant 0 : index
    %c0_5 = arith.constant 0 : index
    %4 = vector.load %arg3[%c0_3, %c0_4, %c0_5] : memref<1x8x128xf32, #tpu.memory_space<vmem>>, vector<1x1x128xf32>
    %5 = vector.shape_cast %4 : vector<1x1x128xf32> to vector<1x128xf32>
    %6 = vector.shape_cast %3 : vector<1x128xf32> to vector<1x1x128xf32>
    tpu.vector_store %arg3[%c0_3, %c0_4, %c0_5], %6 {strides = array<i32>} : memref<1x8x128xf32, #tpu.memory_space<vmem>>, vector<1x1x128xf32>,
    %7 = arith.mulf %0, %0 : vector<16x128xf32>
    %cst_6 = arith.constant dense<0.000000e+00> : vector<128xf32>
    %8 = vector.multi_reduction <add>, %7, %cst_6 [0] : vector<16x128xf32> to vector<128xf32>
    %9 = vector.shape_cast %8 : vector<128xf32> to vector<1x128xf32>
    %c0_7 = arith.constant 0 : index
    %c1 = arith.constant 1 : index
    %c0_8 = arith.constant 0 : index
    %10 = vector.load %arg3[%c0_7, %c1, %c0_8] : memref<1x8x128xf32, #tpu.memory_space<vmem>>, vector<1x1x128xf32>
    %11 = vector.shape_cast %10 : vector<1x1x128xf32> to vector<1x128xf32>
    %12 = vector.shape_cast %9 : vector<1x128xf32> to vector<1x1x128xf32>
    tpu.vector_store %arg3[%c0_7, %c1, %c0_8], %12 {strides = array<i32>} : memref<1x8x128xf32, #tpu.memory_space<vmem>>, vector<1x1x128xf32>,
    %cst_9 = arith.constant dense<0x7F800000> : vector<128xf32>
    %13 = vector.multi_reduction <minimumf>, %0, %cst_9 [0] : vector<16x128xf32> to vector<128xf32>
    %14 = vector.shape_cast %13 : vector<128xf32> to vector<1x128xf32>
    %c0_10 = arith.constant 0 : index
    %c2 = arith.constant 2 : index
    %c0_11 = arith.constant 0 : index
    %15 = vector.load %arg3[%c0_10, %c2, %c0_11] : memref<1x8x128xf32, #tpu.memory_space<vmem>>, vector<1x1x128xf32>
    %16 = vector.shape_cast %15 : vector<1x1x128xf32> to vector<1x128xf32>
    %17 = vector.shape_cast %14 : vector<1x128xf32> to vector<1x1x128xf32>
    tpu.vector_store %arg3[%c0_10, %c2, %c0_11], %17 {strides = array<i32>} : memref<1x8x128xf32, #tpu.memory_space<vmem>>, vector<1x1x128xf32>,
    %cst_12 = arith.constant dense<0xFF800000> : vector<128xf32>
    %18 = vector.multi_reduction <maximumf>, %0, %cst_12 [0] : vector<16x128xf32> to vector<128xf32>
    %19 = vector.shape_cast %18 : vector<128xf32> to vector<1x128xf32>
    %c0_13 = arith.constant 0 : index
    %c3 = arith.constant 3 : index
    %c0_14 = arith.constant 0 : index
    %20 = vector.load %arg3[%c0_13, %c3, %c0_14] : memref<1x8x128xf32, #tpu.memory_space<vmem>>, vector<1x1x128xf32>
    %21 = vector.shape_cast %20 : vector<1x1x128xf32> to vector<1x128xf32>
    %22 = vector.shape_cast %19 : vector<1x128xf32> to vector<1x1x128xf32>
    tpu.vector_store %arg3[%c0_13, %c3, %c0_14], %22 {strides = array<i32>} : memref<1x8x128xf32, #tpu.memory_space<vmem>>, vector<1x1x128xf32>,
    %cst_15 = arith.constant dense<0.000000e+00> : vector<128xf32>
    %23 = vector.multi_reduction <add>, %1, %cst_15 [0] : vector<16x128xf32> to vector<128xf32>
    %24 = vector.shape_cast %23 : vector<128xf32> to vector<1x128xf32>
    %c0_16 = arith.constant 0 : index
    %c4 = arith.constant 4 : index
    %c0_17 = arith.constant 0 : index
    %25 = vector.load %arg3[%c0_16, %c4, %c0_17] : memref<1x8x128xf32, #tpu.memory_space<vmem>>, vector<1x1x128xf32>
    %26 = vector.shape_cast %25 : vector<1x1x128xf32> to vector<1x128xf32>
    %27 = vector.shape_cast %24 : vector<1x128xf32> to vector<1x1x128xf32>
    tpu.vector_store %arg3[%c0_16, %c4, %c0_17], %27 {strides = array<i32>} : memref<1x8x128xf32, #tpu.memory_space<vmem>>, vector<1x1x128xf32>,
    %28 = arith.mulf %1, %1 : vector<16x128xf32>
    %cst_18 = arith.constant dense<0.000000e+00> : vector<128xf32>
    %29 = vector.multi_reduction <add>, %28, %cst_18 [0] : vector<16x128xf32> to vector<128xf32>
    %30 = vector.shape_cast %29 : vector<128xf32> to vector<1x128xf32>
    %c0_19 = arith.constant 0 : index
    %c5 = arith.constant 5 : index
    %c0_20 = arith.constant 0 : index
    %31 = vector.load %arg3[%c0_19, %c5, %c0_20] : memref<1x8x128xf32, #tpu.memory_space<vmem>>, vector<1x1x128xf32>
    %32 = vector.shape_cast %31 : vector<1x1x128xf32> to vector<1x128xf32>
    %33 = vector.shape_cast %30 : vector<1x128xf32> to vector<1x1x128xf32>
    tpu.vector_store %arg3[%c0_19, %c5, %c0_20], %33 {strides = array<i32>} : memref<1x8x128xf32, #tpu.memory_space<vmem>>, vector<1x1x128xf32>,
    %cst_21 = arith.constant dense<0x7F800000> : vector<128xf32>
    %34 = vector.multi_reduction <minimumf>, %1, %cst_21 [0] : vector<16x128xf32> to vector<128xf32>
    %35 = vector.shape_cast %34 : vector<128xf32> to vector<1x128xf32>
    %c0_22 = arith.constant 0 : index
    %c6 = arith.constant 6 : index
    %c0_23 = arith.constant 0 : index
    %36 = vector.load %arg3[%c0_22, %c6, %c0_23] : memref<1x8x128xf32, #tpu.memory_space<vmem>>, vector<1x1x128xf32>
    %37 = vector.shape_cast %36 : vector<1x1x128xf32> to vector<1x128xf32>
    %38 = vector.shape_cast %35 : vector<1x128xf32> to vector<1x1x128xf32>
    tpu.vector_store %arg3[%c0_22, %c6, %c0_23], %38 {strides = array<i32>} : memref<1x8x128xf32, #tpu.memory_space<vmem>>, vector<1x1x128xf32>,
    %cst_24 = arith.constant dense<0xFF800000> : vector<128xf32>
    %39 = vector.multi_reduction <maximumf>, %1, %cst_24 [0] : vector<16x128xf32> to vector<128xf32>
    %40 = vector.shape_cast %39 : vector<128xf32> to vector<1x128xf32>
    %c0_25 = arith.constant 0 : index
    %c7 = arith.constant 7 : index
    %c0_26 = arith.constant 0 : index
    %41 = vector.load %arg3[%c0_25, %c7, %c0_26] : memref<1x8x128xf32, #tpu.memory_space<vmem>>, vector<1x1x128xf32>
    %42 = vector.shape_cast %41 : vector<1x1x128xf32> to vector<1x128xf32>
    %43 = vector.shape_cast %40 : vector<1x128xf32> to vector<1x1x128xf32>
    tpu.vector_store %arg3[%c0_25, %c7, %c0_26], %43 {strides = array<i32>} : memref<1x8x128xf32, #tpu.memory_space<vmem>>, vector<1x1x128xf32>,
    return
  }
  func.func @transform_0(%arg0: i32) -> (i32, i32) {
    %c0_i32 = arith.constant 0 : i32
    %c0_i32_0 = arith.constant 0 : i32
    return %arg0, %c0_i32 : i32, i32
  }
  func.func @transform_1(%arg0: i32) -> (i32, i32) {
    %c0_i32 = arith.constant 0 : i32
    %c0_i32_0 = arith.constant 0 : i32
    return %arg0, %c0_i32 : i32, i32
  }
  func.func @transform_2(%arg0: i32) -> (i32, i32, i32) {
    %c0_i32 = arith.constant 0 : i32
    %c0_i32_0 = arith.constant 0 : i32
    %c0_i32_1 = arith.constant 0 : i32
    return %arg0, %c0_i32, %c0_i32_0 : i32, i32, i32
  }
}

</mosaic_0001>

<bundles_post_ra>
// kernel: tpu_custom_call.1
= control target key start
LH: loop header
LB: loop body
LE: loop exit
PB: predicated region body
PF: predicated region fallthrough
CT: control target
= control target key end

     0   :  { %7 = vsyncpa [#allocation3], 0  ;;  %s261_s0 = inlined_call_operand.hbm [shape: f32[16,128], index: 0, kind: input, shape index: {}]   ;;  %s262_s1 = inlined_call_operand.hbm [shape: f32[16,128], index: 1, kind: input, shape index: {}]   ;;  %s263_s2 = inlined_call_operand.hbm [shape: f32[1,8,128], index: 2, kind: output, shape index: {}]  }
   0x1   :  { %8 = vsyncpa [#allocation6], 0 }
   0x2   :  { %9 = vsyncpa [#allocation4], 0  ;;  %s205_s9 = smov [#allocation2]   ;;  %s133_s13 = scalar_lea.hbm %s261_s0, 256 }
   0x3   :  { %s15_s10 = sshll.u32 %s205_s9, 4  ;;  %p134_p0 = scmp.ne.s32.totalorder %s261_s0, %s133_s13  ;;  %s16_s10 = int_to_ptr.vmem [resolvable:$true] %s15_s10 }
   0x4   :  { %p137_p1 = scmp.lt.u32.totalorder %s133_s13, %s261_s0 }
   0x6   :  { %p139_p2 = pnand %p137_p1, %p134_p0 }
   0x8   :  { %142 = shalt.err (!%p139_p2)
}
   0x9   :  { %s143_s18 = scalar_lea.vmem %s16_s10, 256  ;;  %p148_p4 = scmp.lt.s32.totalorder %s16_s10, %s16_s10 }
   0xa   :  { %p144_p3 = scmp.ne.s32.totalorder %s16_s10, %s143_s18  ;;  %p149_p5 = scmp.lt.s32.totalorder %s143_s18, %s143_s18 }
   0xc   :  { %p150_p6 = por %p149_p5, %p148_p4 }
   0xe   :  { %p151_p7 = pnand %p150_p6, %p144_p3 }
  0x10   :  { %154 = shalt.err (!%p151_p7)
}
  0x11   :  { %s206_s19 = smov 128   ;;  %s207_s20 = smov 8  }
  0x12   :  { %21 = dma.hbm_to_vmem [thread:$0]  %s261_s0, 256, %s16_s10, [#allocation3], %s206_s19, %s206_s19, %s207_s20  }
  0x13   :  { %s208_s23 = smov [#allocation5]   ;;  %s155_s27 = scalar_lea.hbm %s262_s1, 256 }
  0x14   :  { %s27_s24 = sshll.u32 %s208_s23, 4  ;;  %p156_p8 = scmp.ne.s32.totalorder %s262_s1, %s155_s27  ;;  %s28_s24 = int_to_ptr.vmem [resolvable:$true] %s27_s24 }
  0x15   :  { %p159_p9 = scmp.lt.u32.totalorder %s155_s27, %s262_s1 }
  0x17   :  { %p161_p10 = pnand %p159_p9, %p156_p8 }
  0x19   :  { %164 = shalt.err (!%p161_p10)
}
  0x1a   :  { %s165_s4 = scalar_lea.vmem %s28_s24, 256  ;;  %p170_p12 = scmp.lt.s32.totalorder %s28_s24, %s28_s24 }
  0x1b   :  { %p166_p11 = scmp.ne.s32.totalorder %s28_s24, %s165_s4  ;;  %p171_p13 = scmp.lt.s32.totalorder %s165_s4, %s165_s4 }
  0x1d   :  { %p172_p0 = por %p171_p13, %p170_p12 }
  0x1f   :  { %p173_p1 = pnand %p172_p0, %p166_p11 }
  0x21   :  { %176 = shalt.err (!%p173_p1)
}
  0x22   :  { %33 = dma.hbm_to_vmem [thread:$0]  %s262_s1, 256, %s28_s24, [#allocation6], %s206_s19, %s206_s19, %s207_s20  }
  0x23   :  { %199 = dma.done.wait [#allocation3], 256  }
  0x24   :  { %200 = vsyncadd [#allocation3], 4294967040 }
  0x25   :  { %201 = dma.done.wait [#allocation6], 256  }
  0x26   :  { %202 = vsyncadd [#allocation6], 4294967040  ;;  %v40_v0 = vld [vmem:[#allocation2] sm:$0xff]  ;;  %v41_v1 = vld [vmem:[#allocation2 + $0x8] sm:$0xff]  ;;  %s209_s1 = smov [#allocation7]  }
  0x27   :  { %v42_v2 = vld [vmem:[#allocation5] sm:$0xff]  ;;  %v44_v3 = vadd.f32 %v41_v1, %v40_v0  ;;  %v52_v4 = vmul.f32 %v40_v0, %v40_v0  ;;  %v53_v5 = vmul.f32 %v41_v1, %v41_v1  ;;  %v62_v6 = vmin.f32 %v40_v0, %v41_v1  ;;  %v43_v7 = vld [vmem:[#allocation5 + $0x8] sm:$0xff]  ;;  %s118_s6 = sshll.u32 %s209_s1, 4  ;;  %s119_s6 = int_to_ptr.vmem [resolvable:$true] %s118_s6 }
  0x28   :  { %v70_v8 = vmax.f32 %v40_v0, %v41_v1  ;;  %v78_v9 = vadd.f32 %v43_v7, %v42_v2  ;;  %v86_v10 = vmul.f32 %v42_v2, %v42_v2  ;;  %v87_v11 = vmul.f32 %v43_v7, %v43_v7  ;;  %s177_s7 = scalar_lea.vmem %s119_s6, 128  ;;  %p182_p3 = scmp.lt.s32.totalorder %s119_s6, %s119_s6 }
  0x29   :  { %v45_v12 = vrot.slane %v44_v3, 4  ;;  %v54_v13 = vadd.f32 %v53_v5, %v52_v4  ;;  %v63_v14 = vrot.slane %v62_v6, 4  ;;  %v96_v15 = vmin.f32 %v42_v2, %v43_v7  ;;  %p178_p2 = scmp.ne.s32.totalorder %s119_s6, %s177_s7  ;;  %p183_p4 = scmp.lt.s32.totalorder %s177_s7, %s177_s7 }
  0x2a   :  { %v71_v16 = vrot.slane %v70_v8, 4  ;;  %v79_v17 = vrot.slane %v78_v9, 4  ;;  %v88_v18 = vadd.f32 %v87_v11, %v86_v10  ;;  %v104_v19 = vmax.f32 %v42_v2, %v43_v7 }
  0x2b   :  { %v46_v20 = vadd.f32 %v45_v12, %v44_v3  ;;  %v55_v21 = vrot.slane %v54_v13, 4  ;;  %v64_v22 = vmin.f32 %v62_v6, %v63_v14  ;;  %v97_v23 = vrot.slane %v96_v15, 4  ;;  %p184_p5 = por %p183_p4, %p182_p3 }
  0x2c   :  { %v72_v24 = vmax.f32 %v70_v8, %v71_v16  ;;  %v80_v25 = vadd.f32 %v79_v17, %v78_v9  ;;  %v89_v26 = vrot.slane %v88_v18, 4  ;;  %v105_v27 = vrot.slane %v104_v19, 4 }
  0x2d   :  { %v47_v28 = vrot.slane %v46_v20, 2  ;;  %v56_v29 = vadd.f32 %v55_v21, %v54_v13  ;;  %v65_v30 = vrot.slane %v64_v22, 2  ;;  %v98_v31 = vmin.f32 %v96_v15, %v97_v23  ;;  %p185_p6 = pnand %p184_p5, %p178_p2 }
  0x2e   :  { %v73_v32 = vrot.slane %v72_v24, 2  ;;  %v81_v33 = vrot.slane %v80_v25, 2  ;;  %v90_v34 = vadd.f32 %v89_v26, %v88_v18  ;;  %v106_v35 = vmax.f32 %v104_v19, %v105_v27 }
  0x2f   :  { %v48_v36 = vadd.f32 %v47_v28, %v46_v20  ;;  %v57_v37 = vrot.slane %v56_v29, 2  ;;  %v66_v38 = vmin.f32 %v64_v22, %v65_v30  ;;  %v99_v39 = vrot.slane %v98_v31, 2 }
  0x30   :  { %v74_v40 = vmax.f32 %v72_v24, %v73_v32  ;;  %v82_v41 = vadd.f32 %v81_v33, %v80_v25  ;;  %v91_v42 = vrot.slane %v90_v34, 2  ;;  %v107_v43 = vrot.slane %v106_v35, 2 }
  0x31   :  { %v49_v44 = vrot.slane %v48_v36, 1  ;;  %v58_v45 = vadd.f32 %v57_v37, %v56_v29  ;;  %v67_v46 = vrot.slane %v66_v38, 1  ;;  %v100_v47 = vmin.f32 %v98_v31, %v99_v39 }
  0x32   :  { %v75_v48 = vrot.slane %v74_v40, 1  ;;  %v83_v49 = vrot.slane %v82_v41, 1  ;;  %v92_v50 = vadd.f32 %v91_v42, %v90_v34  ;;  %v108_v51 = vmax.f32 %v106_v35, %v107_v43 }
  0x33   :  { %v50_v52 = vadd.f32 %v49_v44, %v48_v36  ;;  %v59_v53 = vrot.slane %v58_v45, 1  ;;  %v68_v54 = vmin.f32 %v66_v38, %v67_v46  ;;  %v101_v55 = vrot.slane %v100_v47, 1 }
  0x34   :  { %v76_v56 = vmax.f32 %v74_v40, %v75_v48  ;;  %v84_v57 = vadd.f32 %v83_v49, %v82_v41  ;;  %v93_v58 = vrot.slane %v92_v50, 1  ;;  %v109_v59 = vrot.slane %v108_v51, 1 }
  0x35   :  { %51 = vst [vmem:[#allocation7] sm:$0x1] %v50_v52  ;;  %v60_v60 = vadd.f32 %v59_v53, %v58_v45  ;;  %69 = vst [vmem:[#allocation7 + $0x2] sm:$0x1] %v68_v54  ;;  %v102_v61 = vmin.f32 %v100_v47, %v101_v55 }
  0x36   :  { %77 = vst [vmem:[#allocation7 + $0x3] sm:$0x1] %v76_v56  ;;  %85 = vst [vmem:[#allocation7 + $0x4] sm:$0x1] %v84_v57  ;;  %v94_v62 = vadd.f32 %v93_v58, %v92_v50  ;;  %v110_v63 = vmax.f32 %v108_v51, %v109_v59 }
  0x37   :  { %61 = vst [vmem:[#allocation7 + $0x1] sm:$0x1] %v60_v60  ;;  %103 = vst [vmem:[#allocation7 + $0x6] sm:$0x1] %v102_v61 }
  0x38   :  { %95 = vst [vmem:[#allocation7 + $0x5] sm:$0x1] %v94_v62  ;;  %111 = vst [vmem:[#allocation7 + $0x7] sm:$0x1] %v110_v63 }
  0x39   :  { %188 = shalt.err (!%p185_p6)
}
  0x3a   :  { %s189_s10 = scalar_lea.hbm %s263_s2, 128 }
  0x3b   :  { %p190_p7 = scmp.ne.s32.totalorder %s263_s2, %s189_s10  ;;  %p193_p8 = scmp.lt.u32.totalorder %s189_s10, %s263_s2 }
  0x3d   :  { %p195_p9 = pnand %p193_p8, %p190_p7 }
  0x3f   :  { %198 = shalt.err (!%p195_p9)
}
  0x40   :  { %121 = dma.vmem_to_hbm [thread:$0]  %s119_s6, 128, %s263_s2, [#allocation4]  }
  0x41   :  { %203 = dma.done.wait [#allocation4], 128  }
  0x42   :  { %204 = vsyncadd [#allocation4], 4294967168 }
  0x43   :  { %125 = vsyncpa [#allocation3], 1 }
  0x44   :  { %126 = vsyncpa [#allocation6], 1 }
  0x45   :  { %127 = vsyncpa [#allocation4], 1 }

</bundles_post_ra>
